<compile_context>
chip_gen: v6e
topology: v6e:2x2x1
jax: 0.10.0
libtpu: 0.0.40
codegen_flags: <defaults>
</compile_context>

<pallas_src>
import functools

import jax
import jax.numpy as jnp
from jax import lax
from jax.experimental import pallas as pl
from jax.experimental.pallas import tpu as pltpu

LN_EPS = 1e-5


def _round_up(x, m):
    return ((x + m - 1) // m) * m


def _cdiv(a, b):
    return -(-a // b)


def _masked_layer_norm(h, gamma, beta, true_dim):
    """LayerNorm over the last dim where only the first `true_dim` columns are
    valid.  Pad columns of `h` are guaranteed exactly zero (zero-padded W/b),
    so the sum over the full width equals the sum over the valid columns; the
    centered values are masked before the variance so pad columns do not
    pollute it.  gamma/beta pad columns are zero, keeping pad outputs at 0."""
    width = h.shape[-1]
    inv_n = 1.0 / float(true_dim)
    mean = jnp.sum(h, axis=-1, keepdims=True) * inv_n
    centered = h - mean
    if true_dim != width:
        cols = lax.broadcasted_iota(jnp.int32, (1, width), 1)
        centered = centered * (cols < true_dim).astype(h.dtype)
    var = jnp.sum(centered * centered, axis=-1, keepdims=True) * inv_n
    return centered * lax.rsqrt(var + LN_EPS) * gamma + beta


def actor_kernel(x_ref,
                 w1_ref, b1_ref, g1_ref, beta1_ref,
                 w2_ref, b2_ref, g2_ref, beta2_ref,
                 w3_ref, b3_ref,
                 out_ref, *, hidden1, hidden2):
    mm_dtype = w1_ref.dtype          # f32 by default; bf16 if weights stored bf16
    x = x_ref[...].astype(mm_dtype)

    # fc1 -> LayerNorm -> ReLU   (MXU matmul, f32 accumulate; epilogue in f32)
    h1 = jnp.dot(x, w1_ref[...], preferred_element_type=jnp.float32) + b1_ref[...]
    h1 = _masked_layer_norm(h1, g1_ref[...], beta1_ref[...], hidden1)
    h1 = jnp.maximum(h1, 0.0)

    # fc2 -> LayerNorm -> ReLU
    h2 = jnp.dot(h1.astype(mm_dtype), w2_ref[...],
                 preferred_element_type=jnp.float32) + b2_ref[...]
    h2 = _masked_layer_norm(h2, g2_ref[...], beta2_ref[...], hidden2)
    h2 = jnp.maximum(h2, 0.0)

    # fc3 -> tanh  (output columns padded to a full 128-lane tile)
    h3 = jnp.dot(h2.astype(mm_dtype), w3_ref[...],
                 preferred_element_type=jnp.float32) + b3_ref[...]
    out_ref[...] = jnp.tanh(h3).astype(out_ref.dtype)


def _pad2(a, rows, cols):
    pr, pc = rows - a.shape[0], cols - a.shape[1]
    if pr or pc:
        a = jnp.pad(a, ((0, pr), (0, pc)))
    return a


def _vmem_budget_bytes(tb, nb_states, h1p, h2p, outp):
    f32 = 4
    params = (nb_states * h1p + 3 * h1p
              + h1p * h2p + 3 * h2p
              + h2p * outp + outp) * f32
    io_tiles = tb * (nb_states + outp) * f32
    acts = tb * (h1p + h2p) * f32
    # double-buffered params + double-buffered x/out tiles + headroom for the
    # f32 activation temporaries, plus a fixed 4 MiB slack.
    est = 2 * params + 2 * io_tiles + 4 * acts + (4 << 20)
    return int(min(max(est, 16 << 20), 48 << 20))


@functools.partial(jax.jit, static_argnames=("block_batch",))
def actor_forward(x, params, *, block_batch=1024):
    """Run the Actor forward pass.  x: (batch, nb_states) f32."""
    (w1, b1, g1, beta1, w2, b2, g2, beta2, w3, b3) = params
    batch, nb_states = x.shape
    hidden1 = w1.shape[1]
    hidden2 = w2.shape[1]
    nb_actions = w3.shape[1]

    # ---- Lane padding of feature dims (NOT the contraction dim nb_states). --
    h1p = _round_up(hidden1, 128)
    h2p = _round_up(hidden2, 128)
    outp = _round_up(nb_actions, 128)

    w1p = _pad2(w1, nb_states, h1p)
    b1p, g1p, be1p = _pad2(b1, 1, h1p), _pad2(g1, 1, h1p), _pad2(beta1, 1, h1p)
    w2p = _pad2(w2, h1p, h2p)
    b2p, g2p, be2p = _pad2(b2, 1, h2p), _pad2(g2, 1, h2p), _pad2(beta2, 1, h2p)
    w3p = _pad2(w3, h2p, outp)
    b3p = _pad2(b3, 1, outp)

    # ---- Batch tiling: minimize padding waste, keep >=2 tiles for megacore. -
    tb_max = max(_round_up(block_batch, 8), 8)
    grid_n = max(_cdiv(batch, tb_max), 1)
    if grid_n == 1 and batch >= 512:
        grid_n = 2          # let "parallel" shard across both TCs on v7x
    tb = _round_up(_cdiv(batch, grid_n), 8)
    padded = tb * grid_n
    if padded != batch:
        x = jnp.pad(x, ((0, padded - batch), (0, 0)))
    grid = (grid_n,)

    def resident(arr):
        # Full-array block, constant index_map -> stays in VMEM across the grid.
        return pl.BlockSpec(arr.shape, lambda i: (0,) * arr.ndim)

    in_specs = [
        pl.BlockSpec((tb, nb_states), lambda i: (i, 0)),   # x tile (pipelined)
        resident(w1p), resident(b1p), resident(g1p), resident(be1p),
        resident(w2p), resident(b2p), resident(g2p), resident(be2p),
        resident(w3p), resident(b3p),
    ]
    out_spec = pl.BlockSpec((tb, outp), lambda i: (i, 0))   # lane-dense writeback

    flops = 2 * padded * (nb_states * hidden1 + hidden1 * hidden2
                          + hidden2 * nb_actions)
    transcendentals = padded * (nb_actions + 2)   # tanh + 2x rsqrt per row
    bytes_accessed = 4 * (padded * nb_states + padded * nb_actions
                          + nb_states * hidden1 + hidden1 * hidden2
                          + hidden2 * nb_actions
                          + 3 * hidden1 + 3 * hidden2 + nb_actions)

    kernel = functools.partial(actor_kernel, hidden1=hidden1, hidden2=hidden2)

    out = pl.pallas_call(
        kernel,
        grid=grid,
        in_specs=in_specs,
        out_specs=out_spec,
        out_shape=jax.ShapeDtypeStruct((padded, outp), jnp.float32),
        compiler_params=pltpu.CompilerParams(
            dimension_semantics=("parallel",),   # megacore sharding on v7x
            vmem_limit_bytes=_vmem_budget_bytes(tb, nb_states, h1p, h2p, outp),
        ),
        cost_estimate=pl.CostEstimate(
            flops=flops,
            transcendentals=transcendentals,
            bytes_accessed=bytes_accessed,
        ),
    )(x, w1p, b1p, g1p, be1p, w2p, b2p, g2p, be2p, w3p, b3p)

    return out[:batch, :nb_actions]


def init_actor_params(key, nb_states, nb_actions, hidden1=400, hidden2=300,
                      init_w=0.003, weight_dtype=jnp.float32):
    """Deterministic init matching the PyTorch module's init scheme.

    PyTorch fanin_init uses size[0] (= out_features of the nn.Linear weight)
    as the fan-in, reproduced literally here. Biases use the nn.Linear default
    uniform(-1/sqrt(in_features), 1/sqrt(in_features)).
    Weights are stored transposed as (in, out); optionally in bf16 to halve
    weight traffic (note: the bf16 path does not match the f32 reference at
    1e-5 tolerance; default stays f32).
    """
    ks = jax.random.split(key, 6)

    def unif(k, shape, bound):
        return jax.random.uniform(k, shape, jnp.float32, -bound, bound)

    v1 = 1.0 / jnp.sqrt(hidden1)          # fanin_init on fc1.weight: size[0]=hidden1
    v2 = 1.0 / jnp.sqrt(hidden2)          # fanin_init on fc2.weight: size[0]=hidden2
    w1 = unif(ks[0], (nb_states, hidden1), v1).astype(weight_dtype)
    b1 = unif(ks[1], (1, hidden1), 1.0 / jnp.sqrt(nb_states))
    w2 = unif(ks[2], (hidden1, hidden2), v2).astype(weight_dtype)
    b2 = unif(ks[3], (1, hidden2), 1.0 / jnp.sqrt(hidden1))
    w3 = unif(ks[4], (hidden2, nb_actions), init_w).astype(weight_dtype)
    b3 = unif(ks[5], (1, nb_actions), 1.0 / jnp.sqrt(hidden2))

    g1 = jnp.ones((1, hidden1), jnp.float32)
    beta1 = jnp.zeros((1, hidden1), jnp.float32)
    g2 = jnp.ones((1, hidden2), jnp.float32)
    beta2 = jnp.zeros((1, hidden2), jnp.float32)

    return (w1, b1, g1, beta1, w2, b2, g2, beta2, w3, b3)


def actor_reference(x, params):
    """Plain-JAX f32 reference for correctness checking."""
    (w1, b1, g1, beta1, w2, b2, g2, beta2, w3, b3) = params

    def ln(h, gamma, beta):
        mean = jnp.mean(h, axis=-1, keepdims=True)
        c = h - mean
        var = jnp.mean(c * c, axis=-1, keepdims=True)
        return c * lax.rsqrt(var + LN_EPS) * gamma + beta

    h = x @ w1.astype(jnp.float32) + b1
    h = jnp.maximum(ln(h, g1, beta1), 0.0)
    h = h @ w2.astype(jnp.float32) + b2
    h = jnp.maximum(ln(h, g2, beta2), 0.0)
    return jnp.tanh(h @ w3.astype(jnp.float32) + b3)


if __name__ == "__main__":
    key = jax.random.PRNGKey(0)
    k_x, k_x2, k_p = jax.random.split(key, 3)

    nb_states, nb_actions = 16, 8
    hidden1, hidden2 = 400, 300
    params = init_actor_params(k_p, nb_states, nb_actions, hidden1, hidden2)

    # Small demo batch (padded to 8 rows inside the wrapper).
    batch = 2
    x = jax.random.normal(k_x, (batch, nb_states), jnp.float32)
    out = jax.block_until_ready(actor_forward(x, params))
    ref = actor_reference(x, params)
    assert out.shape == (batch, nb_actions)
    assert jnp.allclose(out, ref, atol=2e-5, rtol=1e-4)

    # Larger batch exercising a multi-tile grid (grid=3, tb=104, padded 312).
    batch2 = 300
    x2 = jax.random.normal(k_x2, (batch2, nb_states), jnp.float32)
    out2 = jax.block_until_ready(actor_forward(x2, params, block_batch=128))
    ref2 = actor_reference(x2, params)
    assert out2.shape == (batch2, nb_actions)
    assert jnp.allclose(out2, ref2, atol=2e-5, rtol=1e-4)

    print("KERNEL_OK")
</pallas_src>

<mosaic_0001>
module attributes {stable_mosaic.version = 11 : i64} {
  func.func @actor_kernel(%arg0: i32, %arg1: memref<8x16xf32, #tpu.memory_space<vmem>>, %arg2: memref<16x512xf32, #tpu.memory_space<vmem>>, %arg3: memref<1x512xf32, #tpu.memory_space<vmem>>, %arg4: memref<1x512xf32, #tpu.memory_space<vmem>>, %arg5: memref<1x512xf32, #tpu.memory_space<vmem>>, %arg6: memref<512x384xf32, #tpu.memory_space<vmem>>, %arg7: memref<1x384xf32, #tpu.memory_space<vmem>>, %arg8: memref<1x384xf32, #tpu.memory_space<vmem>>, %arg9: memref<1x384xf32, #tpu.memory_space<vmem>>, %arg10: memref<384x128xf32, #tpu.memory_space<vmem>>, %arg11: memref<1x128xf32, #tpu.memory_space<vmem>>, %arg12: memref<8x128xf32, #tpu.memory_space<vmem>>) attributes {dimension_semantics = [#tpu.dimension_semantics<parallel>], iteration_bounds = array<i64: 1>, scalar_prefetch = 0 : i64, scratch_operands = 0 : i64, tpu.core_type = #tpu.core_type<tc>, window_params = [{transform_indices = @transform_0, window_bounds = array<i64: 8, 16>}, {pipeline_mode = #tpu.pipeline_mode<synchronous>, transform_indices = @transform_1, window_bounds = array<i64: 16, 512>}, {pipeline_mode = #tpu.pipeline_mode<synchronous>, transform_indices = @transform_2, window_bounds = array<i64: 1, 512>}, {pipeline_mode = #tpu.pipeline_mode<synchronous>, transform_indices = @transform_3, window_bounds = array<i64: 1, 512>}, {pipeline_mode = #tpu.pipeline_mode<synchronous>, transform_indices = @transform_4, window_bounds = array<i64: 1, 512>}, {pipeline_mode = #tpu.pipeline_mode<synchronous>, transform_indices = @transform_5, window_bounds = array<i64: 512, 384>}, {pipeline_mode = #tpu.pipeline_mode<synchronous>, transform_indices = @transform_6, window_bounds = array<i64: 1, 384>}, {pipeline_mode = #tpu.pipeline_mode<synchronous>, transform_indices = @transform_7, window_bounds = array<i64: 1, 384>}, {pipeline_mode = #tpu.pipeline_mode<synchronous>, transform_indices = @transform_8, window_bounds = array<i64: 1, 384>}, {pipeline_mode = #tpu.pipeline_mode<synchronous>, transform_indices = @transform_9, window_bounds = array<i64: 384, 128>}, {pipeline_mode = #tpu.pipeline_mode<synchronous>, transform_indices = @transform_10, window_bounds = array<i64: 1, 128>}, {transform_indices = @transform_11, window_bounds = array<i64: 8, 128>}]} {
    %c0 = arith.constant 0 : index
    %c0_0 = arith.constant 0 : index
    %0 = vector.load %arg1[%c0, %c0_0] : memref<8x16xf32, #tpu.memory_space<vmem>>, vector<8x16xf32>
    %c0_1 = arith.constant 0 : index
    %c0_2 = arith.constant 0 : index
    %1 = vector.load %arg2[%c0_1, %c0_2] : memref<16x512xf32, #tpu.memory_space<vmem>>, vector<16x512xf32>
    %cst = arith.constant dense<0.000000e+00> : vector<8x512xf32>
    %2 = tpu.matmul %0, %1, %cst {dimension_numbers = #tpu.dot_dimension_numbers<[1], [0], [0], [1], [0, 0, 1, 1], [], []>} : vector<8x16xf32>, vector<16x512xf32>, vector<8x512xf32> -> vector<8x512xf32>
    %c0_3 = arith.constant 0 : index
    %c0_4 = arith.constant 0 : index
    %3 = vector.load %arg3[%c0_3, %c0_4] : memref<1x512xf32, #tpu.memory_space<vmem>>, vector<1x512xf32>
    %4 = vector.broadcast %3 : vector<1x512xf32> to vector<8x512xf32>
    %5 = arith.addf %2, %4 : vector<8x512xf32>
    %c0_5 = arith.constant 0 : index
    %c0_6 = arith.constant 0 : index
    %6 = vector.load %arg4[%c0_5, %c0_6] : memref<1x512xf32, #tpu.memory_space<vmem>>, vector<1x512xf32>
    %c0_7 = arith.constant 0 : index
    %c0_8 = arith.constant 0 : index
    %7 = vector.load %arg5[%c0_7, %c0_8] : memref<1x512xf32, #tpu.memory_space<vmem>>, vector<1x512xf32>
    %cst_9 = arith.constant dense<0.000000e+00> : vector<8xf32>
    %8 = vector.multi_reduction <add>, %5, %cst_9 [1] : vector<8x512xf32> to vector<8xf32>
    %9 = vector.shape_cast %8 : vector<8xf32> to vector<8x1xf32>
    %cst_10 = arith.constant 2.500000e-03 : f32
    %10 = vector.broadcast %cst_10 : f32 to vector<8x1xf32>
    %11 = arith.mulf %9, %10 : vector<8x1xf32>
    %12 = vector.broadcast %11 : vector<8x1xf32> to vector<8x512xf32>
    %13 = arith.subf %5, %12 : vector<8x512xf32>
    %14 = tpu.iota {dimensions = array<i32: 1>} : vector<1x512xi32>
    %c400_i32 = arith.constant 400 : i32
    %15 = vector.broadcast %c400_i32 : i32 to vector<1x512xi32>
    %16 = arith.cmpi slt, %14, %15 : vector<1x512xi32>
    %17 = arith.extui %16 : vector<1x512xi1> to vector<1x512xi32>
    %18 = arith.sitofp %17 : vector<1x512xi32> to vector<1x512xf32>
    %19 = vector.broadcast %18 : vector<1x512xf32> to vector<8x512xf32>
    %20 = arith.mulf %13, %19 : vector<8x512xf32>
    %21 = arith.mulf %20, %20 : vector<8x512xf32>
    %cst_11 = arith.constant dense<0.000000e+00> : vector<8xf32>
    %22 = vector.multi_reduction <add>, %21, %cst_11 [1] : vector<8x512xf32> to vector<8xf32>
    %23 = vector.shape_cast %22 : vector<8xf32> to vector<8x1xf32>
    %cst_12 = arith.constant 2.500000e-03 : f32
    %24 = vector.broadcast %cst_12 : f32 to vector<8x1xf32>
    %25 = arith.mulf %23, %24 : vector<8x1xf32>
    %cst_13 = arith.constant 9.99999974E-6 : f32
    %26 = vector.broadcast %cst_13 : f32 to vector<8x1xf32>
    %27 = arith.addf %25, %26 : vector<8x1xf32>
    %28 = math.rsqrt %27 : vector<8x1xf32>
    %29 = vector.broadcast %28 : vector<8x1xf32> to vector<8x512xf32>
    %30 = arith.mulf %20, %29 : vector<8x512xf32>
    %31 = vector.broadcast %6 : vector<1x512xf32> to vector<8x512xf32>
    %32 = arith.mulf %30, %31 : vector<8x512xf32>
    %33 = vector.broadcast %7 : vector<1x512xf32> to vector<8x512xf32>
    %34 = arith.addf %32, %33 : vector<8x512xf32>
    %cst_14 = arith.constant 0.000000e+00 : f32
    %35 = vector.broadcast %cst_14 : f32 to vector<8x512xf32>
    %36 = arith.maximumf %34, %35 : vector<8x512xf32>
    %c0_15 = arith.constant 0 : index
    %c0_16 = arith.constant 0 : index
    %37 = vector.load %arg6[%c0_15, %c0_16] : memref<512x384xf32, #tpu.memory_space<vmem>>, vector<512x384xf32>
    %cst_17 = arith.constant dense<0.000000e+00> : vector<8x384xf32>
    %38 = tpu.matmul %36, %37, %cst_17 {dimension_numbers = #tpu.dot_dimension_numbers<[1], [0], [0], [1], [0, 0, 1, 1], [], []>} : vector<8x512xf32>, vector<512x384xf32>, vector<8x384xf32> -> vector<8x384xf32>
    %c0_18 = arith.constant 0 : index
    %c0_19 = arith.constant 0 : index
    %39 = vector.load %arg7[%c0_18, %c0_19] : memref<1x384xf32, #tpu.memory_space<vmem>>, vector<1x384xf32>
    %40 = vector.broadcast %39 : vector<1x384xf32> to vector<8x384xf32>
    %41 = arith.addf %38, %40 : vector<8x384xf32>
    %c0_20 = arith.constant 0 : index
    %c0_21 = arith.constant 0 : index
    %42 = vector.load %arg8[%c0_20, %c0_21] : memref<1x384xf32, #tpu.memory_space<vmem>>, vector<1x384xf32>
    %c0_22 = arith.constant 0 : index
    %c0_23 = arith.constant 0 : index
    %43 = vector.load %arg9[%c0_22, %c0_23] : memref<1x384xf32, #tpu.memory_space<vmem>>, vector<1x384xf32>
    %cst_24 = arith.constant dense<0.000000e+00> : vector<8xf32>
    %44 = vector.multi_reduction <add>, %41, %cst_24 [1] : vector<8x384xf32> to vector<8xf32>
    %45 = vector.shape_cast %44 : vector<8xf32> to vector<8x1xf32>
    %cst_25 = arith.constant 0.00333333341 : f32
    %46 = vector.broadcast %cst_25 : f32 to vector<8x1xf32>
    %47 = arith.mulf %45, %46 : vector<8x1xf32>
    %48 = vector.broadcast %47 : vector<8x1xf32> to vector<8x384xf32>
    %49 = arith.subf %41, %48 : vector<8x384xf32>
    %50 = tpu.iota {dimensions = array<i32: 1>} : vector<1x384xi32>
    %c300_i32 = arith.constant 300 : i32
    %51 = vector.broadcast %c300_i32 : i32 to vector<1x384xi32>
    %52 = arith.cmpi slt, %50, %51 : vector<1x384xi32>
    %53 = arith.extui %52 : vector<1x384xi1> to vector<1x384xi32>
    %54 = arith.sitofp %53 : vector<1x384xi32> to vector<1x384xf32>
    %55 = vector.broadcast %54 : vector<1x384xf32> to vector<8x384xf32>
    %56 = arith.mulf %49, %55 : vector<8x384xf32>
    %57 = arith.mulf %56, %56 : vector<8x384xf32>
    %cst_26 = arith.constant dense<0.000000e+00> : vector<8xf32>
    %58 = vector.multi_reduction <add>, %57, %cst_26 [1] : vector<8x384xf32> to vector<8xf32>
    %59 = vector.shape_cast %58 : vector<8xf32> to vector<8x1xf32>
    %cst_27 = arith.constant 0.00333333341 : f32
    %60 = vector.broadcast %cst_27 : f32 to vector<8x1xf32>
    %61 = arith.mulf %59, %60 : vector<8x1xf32>
    %cst_28 = arith.constant 9.99999974E-6 : f32
    %62 = vector.broadcast %cst_28 : f32 to vector<8x1xf32>
    %63 = arith.addf %61, %62 : vector<8x1xf32>
    %64 = math.rsqrt %63 : vector<8x1xf32>
    %65 = vector.broadcast %64 : vector<8x1xf32> to vector<8x384xf32>
    %66 = arith.mulf %56, %65 : vector<8x384xf32>
    %67 = vector.broadcast %42 : vector<1x384xf32> to vector<8x384xf32>
    %68 = arith.mulf %66, %67 : vector<8x384xf32>
    %69 = vector.broadcast %43 : vector<1x384xf32> to vector<8x384xf32>
    %70 = arith.addf %68, %69 : vector<8x384xf32>
    %cst_29 = arith.constant 0.000000e+00 : f32
    %71 = vector.broadcast %cst_29 : f32 to vector<8x384xf32>
    %72 = arith.maximumf %70, %71 : vector<8x384xf32>
    %c0_30 = arith.constant 0 : index
    %c0_31 = arith.constant 0 : index
    %73 = vector.load %arg10[%c0_30, %c0_31] : memref<384x128xf32, #tpu.memory_space<vmem>>, vector<384x128xf32>
    %cst_32 = arith.constant dense<0.000000e+00> : vector<8x128xf32>
    %74 = tpu.matmul %72, %73, %cst_32 {dimension_numbers = #tpu.dot_dimension_numbers<[1], [0], [0], [1], [0, 0, 1, 1], [], []>} : vector<8x384xf32>, vector<384x128xf32>, vector<8x128xf32> -> vector<8x128xf32>
    %c0_33 = arith.constant 0 : index
    %c0_34 = arith.constant 0 : index
    %75 = vector.load %arg11[%c0_33, %c0_34] : memref<1x128xf32, #tpu.memory_space<vmem>>, vector<1x128xf32>
    %76 = vector.broadcast %75 : vector<1x128xf32> to vector<8x128xf32>
    %77 = arith.addf %74, %76 : vector<8x128xf32>
    %78 = math.tanh %77 : vector<8x128xf32>
    %c0_35 = arith.constant 0 : index
    %c0_36 = arith.constant 0 : index
    %79 = vector.load %arg12[%c0_35, %c0_36] : memref<8x128xf32, #tpu.memory_space<vmem>>, vector<8x128xf32>
    tpu.vector_store %arg12[%c0_35, %c0_36], %78 {strides = array<i32>} : memref<8x128xf32, #tpu.memory_space<vmem>>, vector<8x128xf32>,
    return
  }
  func.func @transform_0(%arg0: i32) -> (i32, i32) {
    %c0_i32 = arith.constant 0 : i32
    %c0_i32_0 = arith.constant 0 : i32
    return %arg0, %c0_i32 : i32, i32
  }
  func.func @transform_1(%arg0: i32) -> (i32, i32) {
    %c0_i32 = arith.constant 0 : i32
    %c0_i32_0 = arith.constant 0 : i32
    %c0_i32_1 = arith.constant 0 : i32
    return %c0_i32, %c0_i32_0 : i32, i32
  }
  func.func @transform_2(%arg0: i32) -> (i32, i32) {
    %c0_i32 = arith.constant 0 : i32
    %c0_i32_0 = arith.constant 0 : i32
    %c0_i32_1 = arith.constant 0 : i32
    return %c0_i32, %c0_i32_0 : i32, i32
  }
  func.func @transform_3(%arg0: i32) -> (i32, i32) {
    %c0_i32 = arith.constant 0 : i32
    %c0_i32_0 = arith.constant 0 : i32
    %c0_i32_1 = arith.constant 0 : i32
    return %c0_i32, %c0_i32_0 : i32, i32
  }
  func.func @transform_4(%arg0: i32) -> (i32, i32) {
    %c0_i32 = arith.constant 0 : i32
    %c0_i32_0 = arith.constant 0 : i32
    %c0_i32_1 = arith.constant 0 : i32
    return %c0_i32, %c0_i32_0 : i32, i32
  }
  func.func @transform_5(%arg0: i32) -> (i32, i32) {
    %c0_i32 = arith.constant 0 : i32
    %c0_i32_0 = arith.constant 0 : i32
    %c0_i32_1 = arith.constant 0 : i32
    return %c0_i32, %c0_i32_0 : i32, i32
  }
  func.func @transform_6(%arg0: i32) -> (i32, i32) {
    %c0_i32 = arith.constant 0 : i32
    %c0_i32_0 = arith.constant 0 : i32
    %c0_i32_1 = arith.constant 0 : i32
    return %c0_i32, %c0_i32_0 : i32, i32
  }
  func.func @transform_7(%arg0: i32) -> (i32, i32) {
    %c0_i32 = arith.constant 0 : i32
    %c0_i32_0 = arith.constant 0 : i32
    %c0_i32_1 = arith.constant 0 : i32
    return %c0_i32, %c0_i32_0 : i32, i32
  }
  func.func @transform_8(%arg0: i32) -> (i32, i32) {
    %c0_i32 = arith.constant 0 : i32
    %c0_i32_0 = arith.constant 0 : i32
    %c0_i32_1 = arith.constant 0 : i32
    return %c0_i32, %c0_i32_0 : i32, i32
  }
  func.func @transform_9(%arg0: i32) -> (i32, i32) {
    %c0_i32 = arith.constant 0 : i32
    %c0_i32_0 = arith.constant 0 : i32
    %c0_i32_1 = arith.constant 0 : i32
    return %c0_i32, %c0_i32_0 : i32, i32
  }
  func.func @transform_10(%arg0: i32) -> (i32, i32) {
    %c0_i32 = arith.constant 0 : i32
    %c0_i32_0 = arith.constant 0 : i32
    %c0_i32_1 = arith.constant 0 : i32
    return %c0_i32, %c0_i32_0 : i32, i32
  }
  func.func @transform_11(%arg0: i32) -> (i32, i32) {
    %c0_i32 = arith.constant 0 : i32
    %c0_i32_0 = arith.constant 0 : i32
    return %arg0, %c0_i32 : i32, i32
  }
}

</mosaic_0001>

<bundles_post_ra>
// kernel: actor_forward.1
= control target key start
LH: loop header
LB: loop body
LE: loop exit
PB: predicated region body
PF: predicated region fallthrough
CT: control target
= control target key end

     0   :  { %v1256_v3 = vmov 0.0   ;;  %vm69_vm0 = vcmask 130048   ;;  %v49_v10 = vlaneseq  ;;  %vm1257_vm3 = vmmov 0   ;;  %s2210_s1 = inlined_call_operand.vmem [shape: f32[16,512], index: 1, kind: input, shape index: {}]   ;;  %s2211_s0 = inlined_call_operand.vmem [shape: f32[8,16], index: 0, kind: input, shape index: {}]   ;;  %s2212_s2 = inlined_call_operand.vmem [shape: f32[1,512], index: 2, kind: input, shape index: {}]   ;;  %s2213_s5 = inlined_call_operand.vmem [shape: f32[512,384], index: 5, kind: input, shape index: {}]   ;;  %s2214_s3 = inlined_call_operand.vmem [shape: f32[1,512], index: 3, kind: input, shape index: {}]   ;;  %s2215_s4 = inlined_call_operand.vmem [shape: f32[1,512], index: 4, kind: input, shape index: {}]   ;;  %s2216_s6 = inlined_call_operand.vmem [shape: f32[1,384], index: 6, kind: input, shape index: {}]   ;;  %s2217_s9 = inlined_call_operand.vmem [shape: f32[384,128], index: 9, kind: input, shape index: {}]   ;;  %s2218_s7 = inlined_call_operand.vmem [shape: f32[1,384], index: 7, kind: input, shape index: {}]   ;;  %s2219_s8 = inlined_call_operand.vmem [shape: f32[1,384], index: 8, kind: input, shape index: {}]   ;;  %s2220_s10 = inlined_call_operand.vmem [shape: f32[1,128], index: 10, kind: input, shape index: {}]   ;;  %s2221_s11 = inlined_call_operand.vmem [shape: f32[8,128], index: 11, kind: output, shape index: {}]  }
   0x1   :  { %v44_v0 = vld [vmem:[%s2210_s1 + $0x28] sm:$0xff]  ;;  %v43_v1 = vld [vmem:[%s2210_s1 + $0x20] sm:$0xff]  ;;  %137 = vmatprep.mubr.f32.mxu0 %v1256_v3  ;;  %208 = vmatprep.mubr.f32.mxu1 %v1256_v3  ;;  %v46_v4 = vld [vmem:[%s2210_s1 + $0x38] sm:$0xff] }
   0x2   :  { %v40_v2 = vld [vmem:[%s2210_s1 + $0x8] sm:$0xff]  ;;  %101 = vmatprep.subr.mxu0 %v44_v0  ;;  %v39_v5 = vld [vmem:[%s2210_s1] sm:$0xff]  ;;  %v45_v6 = vld [vmem:[%s2210_s1 + $0x30] sm:$0xff]  ;;  %172 = vmatprep.subr.mxu1 %v46_v4  ;;  %v50_v11 = vshrl.u32 %v49_v10, 7 }
   0x3   :  { %102 = vmatpush1.msra.mxu0 %v43_v1  ;;  %v38_v7 = vld [vmem:[%s2211_s0] sm:$0xff]  ;;  %v42_v8 = vld [vmem:[%s2210_s1 + $0x18] sm:$0xff]  ;;  %v41_v9 = vld [vmem:[%s2210_s1 + $0x10] sm:$0xff]  ;;  %173 = vmatpush1.msra.mxu1 %v45_v6 }
   0x4   :  { %103 = vmatprep.subr.mxu0 %v40_v2  ;;  %174 = vmatprep.subr.mxu1 %v42_v8  ;;  %v1348_v12 = vsub.s32 0, %v50_v11  ;;  %v1350_v13 = vsub.s32 1, %v50_v11  ;;  %v1352_v14 = vsub.s32 2, %v50_v11  ;;  %v47_v15 = vld [vmem:[%s2212_s2] sm:$0xf]  ;;  %v1360_v19 = vsub.s32 3, %v50_v11 }
   0x5   :  { %104 = vmatpush1.msra.mxu0 %v39_v5  ;;  %175 = vmatpush1.msra.mxu1 %v41_v9  ;;  %v364_v32 = vld [vmem:[%s2213_s5 + $0x170] sm:$0xff]  ;;  %v363_v34 = vld [vmem:[%s2213_s5 + $0x168] sm:$0xff]  ;;  %v361_v36 = vld [vmem:[%s2213_s5 + $0x158] sm:$0xff] }
   0x6   :  { %1086 = vmatmul.mubr.msk.f32.vlgmr.msra.gmra.mxu0 %vm69_vm0, %v38_v7  ;;  %1087 = vmatmul.mubr.msk.f32.vlgmr.msra.gmra.mxu1 %vm69_vm0, %v38_v7  ;;  %v52_v16 = vrot.slane %v47_v15, %v1348_v12  ;;  %v56_v17 = vrot.slane %v47_v15, %v1350_v13  ;;  %v60_v18 = vrot.slane %v47_v15, %v1352_v14  ;;  %v460_v33 = vld [vmem:[%s2213_s5 + $0x470] sm:$0xff]  ;;  %v459_v35 = vld [vmem:[%s2213_s5 + $0x468] sm:$0xff]  ;;  %v457_v37 = vld [vmem:[%s2213_s5 + $0x458] sm:$0xff] }
   0x7   :  { %v64_v26 = vrot.slane %v47_v15, %v1360_v19  ;;  %527 = vmatprep.subr.mxu0 %v364_v32  ;;  %598 = vmatprep.subr.mxu1 %v460_v33  ;;  %v360_v38 = vld [vmem:[%s2213_s5 + $0x150] sm:$0xff]  ;;  %v358_v40 = vld [vmem:[%s2213_s5 + $0x140] sm:$0xff]  ;;  %v357_v42 = vld [vmem:[%s2213_s5 + $0x138] sm:$0xff] }
   0x8   :  { %528 = vmatpush1.msra.mxu0 %v363_v34  ;;  %599 = vmatpush1.msra.mxu1 %v459_v35  ;;  %v456_v39 = vld [vmem:[%s2213_s5 + $0x450] sm:$0xff]  ;;  %v454_v41 = vld [vmem:[%s2213_s5 + $0x440] sm:$0xff]  ;;  %v453_v43 = vld [vmem:[%s2213_s5 + $0x438] sm:$0xff] }
   0x9   :  { %529 = vmatprep.subr.mxu0 %v361_v36  ;;  %600 = vmatprep.subr.mxu1 %v457_v37  ;;  %v355_v44 = vld [vmem:[%s2213_s5 + $0x128] sm:$0xff]  ;;  %v354_v46 = vld [vmem:[%s2213_s5 + $0x120] sm:$0xff]  ;;  %v352_v48 = vld [vmem:[%s2213_s5 + $0x110] sm:$0xff] }
   0xa   :  { %530 = vmatpush1.msra.mxu0 %v360_v38  ;;  %601 = vmatpush1.msra.mxu1 %v456_v39  ;;  %v451_v45 = vld [vmem:[%s2213_s5 + $0x428] sm:$0xff]  ;;  %v450_v47 = vld [vmem:[%s2213_s5 + $0x420] sm:$0xff]  ;;  %v448_v49 = vld [vmem:[%s2213_s5 + $0x410] sm:$0xff] }
   0xb   :  { %531 = vmatprep.subr.mxu0 %v358_v40  ;;  %602 = vmatprep.subr.mxu1 %v454_v41  ;;  %v351_v50 = vld [vmem:[%s2213_s5 + $0x108] sm:$0xff]  ;;  %v349_v52 = vld [vmem:[%s2213_s5 + $0xf8] sm:$0xff]  ;;  %v348_v54 = vld [vmem:[%s2213_s5 + $0xf0] sm:$0xff] }
   0xc   :  { %532 = vmatpush1.msra.mxu0 %v357_v42  ;;  %603 = vmatpush1.msra.mxu1 %v453_v43  ;;  %v447_v51 = vld [vmem:[%s2213_s5 + $0x408] sm:$0xff]  ;;  %v445_v53 = vld [vmem:[%s2213_s5 + $0x3f8] sm:$0xff]  ;;  %v444_v55 = vld [vmem:[%s2213_s5 + $0x3f0] sm:$0xff] }
   0xd   :  { %533 = vmatprep.subr.mxu0 %v355_v44  ;;  %604 = vmatprep.subr.mxu1 %v451_v45  ;;  %v346_v56 = vld [vmem:[%s2213_s5 + $0xe0] sm:$0xff]  ;;  %v345_v58 = vld [vmem:[%s2213_s5 + $0xd8] sm:$0xff]  ;;  %v343_v60 = vld [vmem:[%s2213_s5 + $0xc8] sm:$0xff] }
   0xe   :  { %534 = vmatpush1.msra.mxu0 %v354_v46  ;;  %605 = vmatpush1.msra.mxu1 %v450_v47  ;;  %v442_v57 = vld [vmem:[%s2213_s5 + $0x3e0] sm:$0xff]  ;;  %v441_v59 = vld [vmem:[%s2213_s5 + $0x3d8] sm:$0xff]  ;;  %v439_v61 = vld [vmem:[%s2213_s5 + $0x3c8] sm:$0xff] }
   0xf   :  { %535 = vmatprep.subr.mxu0 %v352_v48  ;;  %606 = vmatprep.subr.mxu1 %v448_v49  ;;  %v342_v62 = vld [vmem:[%s2213_s5 + $0xc0] sm:$0xff]  ;;  %v340_v0 = vld [vmem:[%s2213_s5 + $0xb0] sm:$0xff]  ;;  %v339_v2 = vld [vmem:[%s2213_s5 + $0xa8] sm:$0xff] }
  0x10   :  { %536 = vmatpush1.msra.mxu0 %v351_v50  ;;  %607 = vmatpush1.msra.mxu1 %v447_v51  ;;  %v438_v63 = vld [vmem:[%s2213_s5 + $0x3c0] sm:$0xff]  ;;  %v436_v1 = vld [vmem:[%s2213_s5 + $0x3b0] sm:$0xff]  ;;  %v435_v4 = vld [vmem:[%s2213_s5 + $0x3a8] sm:$0xff] }
  0x11   :  { %537 = vmatprep.subr.mxu0 %v349_v52  ;;  %608 = vmatprep.subr.mxu1 %v445_v53  ;;  %v337_v5 = vld [vmem:[%s2213_s5 + $0x98] sm:$0xff]  ;;  %v336_v7 = vld [vmem:[%s2213_s5 + $0x90] sm:$0xff]  ;;  %v334_v9 = vld [vmem:[%s2213_s5 + $0x80] sm:$0xff] }
  0x12   :  { %538 = vmatpush1.msra.mxu0 %v348_v54  ;;  %609 = vmatpush1.msra.mxu1 %v444_v55  ;;  %v433_v6 = vld [vmem:[%s2213_s5 + $0x398] sm:$0xff]  ;;  %v432_v8 = vld [vmem:[%s2213_s5 + $0x390] sm:$0xff]  ;;  %v430_v11 = vld [vmem:[%s2213_s5 + $0x380] sm:$0xff]  ;;  %v1604_v54 = vand.u32 127, %v49_v10 }
  0x13   :  { %539 = vmatprep.subr.mxu0 %v346_v56  ;;  %610 = vmatprep.subr.mxu1 %v442_v57  ;;  %v333_v15 = vld [vmem:[%s2213_s5 + $0x78] sm:$0xff]  ;;  %v324_v32 = vld [vmem:[%s2213_s5 + $0x30] sm:$0xff]  ;;  %v322_v34 = vld [vmem:[%s2213_s5 + $0x20] sm:$0xff] }
  0x14   :  { %540 = vmatpush1.msra.mxu0 %v345_v58  ;;  %611 = vmatpush1.msra.mxu1 %v441_v59  ;;  %v420_v33 = vld [vmem:[%s2213_s5 + $0x330] sm:$0xff]  ;;  %v418_v35 = vld [vmem:[%s2213_s5 + $0x320] sm:$0xff]  ;;  %v321_v36 = vld [vmem:[%s2213_s5 + $0x18] sm:$0xff]  ;;  %v231_v55 = vadd.s32 384, %v1604_v54 }
  0x15   :  { %541 = vmatprep.subr.mxu0 %v343_v60  ;;  %612 = vmatprep.subr.mxu1 %v439_v61  ;;  %v417_v37 = vld [vmem:[%s2213_s5 + $0x318] sm:$0xff]  ;;  %v319_v38 = vld [vmem:[%s2213_s5 + $0x8] sm:$0xff]  ;;  %v318_v40 = vld [vmem:[%s2213_s5] sm:$0xff] }
  0x16   :  { %542 = vmatpush1.msra.mxu0 %v342_v62  ;;  %613 = vmatpush1.msra.mxu1 %v438_v63  ;;  %v415_v39 = vld [vmem:[%s2213_s5 + $0x308] sm:$0xff]  ;;  %v414_v41 = vld [vmem:[%s2213_s5 + $0x300] sm:$0xff]  ;;  %v412_v42 = vld [vmem:[%s2213_s5 + $0x2f0] sm:$0xff]  ;;  %vm235_vm1 = vcmp.lt.s32.totalorder %v231_v55, 400 }
  0x17   :  { %543 = vmatprep.subr.mxu0 %v340_v0  ;;  %614 = vmatprep.subr.mxu1 %v436_v1  ;;  %v508_v43 = vld [vmem:[%s2213_s5 + $0x5f0] sm:$0xff]  ;;  %v411_v44 = vld [vmem:[%s2213_s5 + $0x2e8] sm:$0xff]  ;;  %v409_v46 = vld [vmem:[%s2213_s5 + $0x2d8] sm:$0xff]  ;;  %v1088_v58 = vsel %vm235_vm1, 1.0, %v1256_v3 }
  0x18   :  { %544 = vmatpush1.msra.mxu0 %v339_v2  ;;  %615 = vmatpush1.msra.mxu1 %v435_v4  ;;  %v507_v45 = vld [vmem:[%s2213_s5 + $0x5e8] sm:$0xff]  ;;  %v505_v47 = vld [vmem:[%s2213_s5 + $0x5d8] sm:$0xff]  ;;  %v408_v48 = vld [vmem:[%s2213_s5 + $0x2d0] sm:$0xff] }
  0x19   :  { %545 = vmatprep.subr.mxu0 %v337_v5  ;;  %616 = vmatprep.subr.mxu1 %v433_v6  ;;  %v504_v49 = vld [vmem:[%s2213_s5 + $0x5d0] sm:$0xff]  ;;  %v406_v50 = vld [vmem:[%s2213_s5 + $0x2c0] sm:$0xff]  ;;  %v405_v52 = vld [vmem:[%s2213_s5 + $0x2b8] sm:$0xff] }
  0x1a   :  { %546 = vmatpush1.msra.mxu0 %v336_v7  ;;  %617 = vmatpush1.msra.mxu1 %v432_v8  ;;  %v502_v51 = vld [vmem:[%s2213_s5 + $0x5c0] sm:$0xff]  ;;  %v501_v53 = vld [vmem:[%s2213_s5 + $0x5b8] sm:$0xff]  ;;  %v499_v4 = vld [vmem:[%s2213_s5 + $0x5a8] sm:$0xff] }
  0x1b   :  { %547 = vmatprep.subr.mxu0 %v334_v9  ;;  %618 = vmatprep.subr.mxu1 %v430_v11  ;;  %v402_v5 = vld [vmem:[%s2213_s5 + $0x2a0] sm:$0xff]  ;;  %v400_v7 = vld [vmem:[%s2213_s5 + $0x290] sm:$0xff]  ;;  %v399_v9 = vld [vmem:[%s2213_s5 + $0x288] sm:$0xff] }
  0x1c   :  { %548 = vmatpush1.msra.mxu0 %v333_v15  ;;  %v498_v6 = vld [vmem:[%s2213_s5 + $0x5a0] sm:$0xff]  ;;  %v496_v8 = vld [vmem:[%s2213_s5 + $0x590] sm:$0xff]  ;;  %v495_v11 = vld [vmem:[%s2213_s5 + $0x588] sm:$0xff] }
  0x1d   :  { %v397_v15 = vld [vmem:[%s2213_s5 + $0x278] sm:$0xff]  ;;  %v372_v55 = vld [vmem:[%s2213_s5 + $0x1b0] sm:$0xff] }
  0xc6   :  { %v139_v20 = vpop.f32.mrf.mxu0  ;;  %v210_v21 = vpop.f32.mrf.mxu1 }
  0xc7   :  { %v1362_v23 = vadd.f32 %v139_v20, %v52_v16  ;;  %v1366_v25 = vadd.f32 %v210_v21, %v60_v18  ;;  %v429_v16 = vld [vmem:[%s2213_s5 + $0x378] sm:$0xff]  ;;  %v427_v18 = vld [vmem:[%s2213_s5 + $0x368] sm:$0xff]  ;;  %v330_v20 = vld [vmem:[%s2213_s5 + $0x60] sm:$0xff] }
  0xc8   :  { %v141_v22 = vpop.f32.mrf.mxu0  ;;  %v212_v27 = vpop.f32.mrf.mxu1  ;;  %v426_v21 = vld [vmem:[%s2213_s5 + $0x360] sm:$0xff]  ;;  %619 = vmatpush1.msra.mxu1 %v429_v16  ;;  %v493_v16 = vld [vmem:[%s2213_s5 + $0x578] sm:$0xff] }
  0xc9   :  { %v1364_v24 = vadd.f32 %v141_v22, %v56_v17  ;;  %v1371_v29 = vadd.f32 %v212_v27, %v64_v26  ;;  %v331_v17 = vld [vmem:[%s2213_s5 + $0x68] sm:$0xff]  ;;  %v328_v22 = vld [vmem:[%s2213_s5 + $0x50] sm:$0xff]  ;;  %620 = vmatprep.subr.mxu1 %v427_v18 }
  0xca   :  { %v424_v26 = vld [vmem:[%s2213_s5 + $0x350] sm:$0xff]  ;;  %549 = vmatprep.subr.mxu0 %v331_v17  ;;  %v327_v27 = vld [vmem:[%s2213_s5 + $0x48] sm:$0xff]  ;;  %621 = vmatpush1.msra.mxu1 %v426_v21  ;;  %v490_v21 = vld [vmem:[%s2213_s5 + $0x560] sm:$0xff] }
  0xcb   :  { %v217_v28 = vadd.f32 %v1364_v24, %v1362_v23  ;;  %550 = vmatpush1.msra.mxu0 %v330_v20  ;;  %622 = vmatprep.subr.mxu1 %v424_v26  ;;  %v396_v17 = vld [vmem:[%s2213_s5 + $0x270] sm:$0xff]  ;;  %v394_v20 = vld [vmem:[%s2213_s5 + $0x260] sm:$0xff]  ;;  %v489_v26 = vld [vmem:[%s2213_s5 + $0x558] sm:$0xff] }
  0xcc   :  { %551 = vmatprep.subr.mxu0 %v328_v22  ;;  %v492_v18 = vld [vmem:[%s2213_s5 + $0x570] sm:$0xff]  ;;  %v393_v22 = vld [vmem:[%s2213_s5 + $0x258] sm:$0xff] }
  0xcd   :  { %v218_v30 = vadd.f32 %v217_v28, %v1366_v25  ;;  %v423_v28 = vld [vmem:[%s2213_s5 + $0x348] sm:$0xff]  ;;  %552 = vmatpush1.msra.mxu0 %v327_v27 }
  0xce   :  { %623 = vmatpush1.msra.mxu1 %v423_v28  ;;  %v391_v27 = vld [vmem:[%s2213_s5 + $0x248] sm:$0xff] }
  0xcf   :  { %v219_v31 = vadd.f32 %v218_v30, %v1371_v29  ;;  %v325_v30 = vld [vmem:[%s2213_s5 + $0x38] sm:$0xff]  ;;  %v487_v28 = vld [vmem:[%s2213_s5 + $0x548] sm:$0xff] }
  0xd0   :  { %553 = vmatprep.subr.mxu0 %v325_v30  ;;  %v390_v30 = vld [vmem:[%s2213_s5 + $0x240] sm:$0xff] }
  0xd1   :  { %220 = vadd.xlane.f32.xlu0 %v219_v31  ;;  %v421_v31 = vld [vmem:[%s2213_s5 + $0x338] sm:$0xff]  ;;  %554 = vmatpush1.msra.mxu0 %v324_v32  ;;  %v388_v32 = vld [vmem:[%s2213_s5 + $0x230] sm:$0xff] }
  0xd2   :  { %624 = vmatprep.subr.mxu1 %v421_v31  ;;  %555 = vmatprep.subr.mxu0 %v322_v34  ;;  %v486_v31 = vld [vmem:[%s2213_s5 + $0x540] sm:$0xff]  ;;  %v387_v34 = vld [vmem:[%s2213_s5 + $0x228] sm:$0xff] }
  0xd3   :  { %625 = vmatpush1.msra.mxu1 %v420_v33  ;;  %556 = vmatpush1.msra.mxu0 %v321_v36  ;;  %v484_v33 = vld [vmem:[%s2213_s5 + $0x530] sm:$0xff]  ;;  %v385_v36 = vld [vmem:[%s2213_s5 + $0x218] sm:$0xff] }
  0xd4   :  { %626 = vmatprep.subr.mxu1 %v418_v35  ;;  %557 = vmatprep.subr.mxu0 %v319_v38  ;;  %v483_v35 = vld [vmem:[%s2213_s5 + $0x528] sm:$0xff]  ;;  %v384_v38 = vld [vmem:[%s2213_s5 + $0x210] sm:$0xff] }
  0xd5   :  { %627 = vmatpush1.msra.mxu1 %v417_v37  ;;  %558 = vmatpush1.msra.mxu0 %v318_v40  ;;  %v481_v37 = vld [vmem:[%s2213_s5 + $0x518] sm:$0xff]  ;;  %v382_v40 = vld [vmem:[%s2213_s5 + $0x200] sm:$0xff] }
  0xd6   :  { %628 = vmatprep.subr.mxu1 %v415_v39  ;;  %559 = vmatprep.subr.mxu0 %v412_v42  ;;  %v480_v39 = vld [vmem:[%s2213_s5 + $0x510] sm:$0xff]  ;;  %v381_v42 = vld [vmem:[%s2213_s5 + $0x1f8] sm:$0xff] }
  0xd7   :  { %629 = vmatpush1.msra.mxu1 %v414_v41  ;;  %560 = vmatpush2.msra.mxu0 %v411_v44  ;;  %v478_v41 = vld [vmem:[%s2213_s5 + $0x500] sm:$0xff]  ;;  %v379_v44 = vld [vmem:[%s2213_s5 + $0x1e8] sm:$0xff] }
  0xd8   :  { %630 = vmatprep.subr.mxu1 %v508_v43  ;;  %561 = vmatprep.subr.mxu0 %v409_v46  ;;  %v477_v43 = vld [vmem:[%s2213_s5 + $0x4f8] sm:$0xff]  ;;  %v378_v46 = vld [vmem:[%s2213_s5 + $0x1e0] sm:$0xff] }
  0xd9   :  { %631 = vmatpush2.msra.mxu1 %v507_v45  ;;  %562 = vmatpush2.msra.mxu0 %v408_v48  ;;  %v475_v45 = vld [vmem:[%s2213_s5 + $0x4e8] sm:$0xff]  ;;  %v376_v48 = vld [vmem:[%s2213_s5 + $0x1d0] sm:$0xff] }
  0xda   :  { %632 = vmatprep.subr.mxu1 %v505_v47  ;;  %563 = vmatprep.subr.mxu0 %v406_v50  ;;  %v474_v47 = vld [vmem:[%s2213_s5 + $0x4e0] sm:$0xff]  ;;  %v375_v50 = vld [vmem:[%s2213_s5 + $0x1c8] sm:$0xff] }
  0xdb   :  { %633 = vmatpush2.msra.mxu1 %v504_v49  ;;  %564 = vmatpush2.msra.mxu0 %v405_v52  ;;  %v472_v49 = vld [vmem:[%s2213_s5 + $0x4d0] sm:$0xff]  ;;  %v373_v52 = vld [vmem:[%s2213_s5 + $0x1b8] sm:$0xff] }
  0xdc   :  { %634 = vmatprep.subr.mxu1 %v502_v51  ;;  %v471_v51 = vld [vmem:[%s2213_s5 + $0x4c8] sm:$0xff] }
  0xdd   :  { %635 = vmatpush2.msra.mxu1 %v501_v53  ;;  %v469_v53 = vld [vmem:[%s2213_s5 + $0x4b8] sm:$0xff] }
  0xde   :  { %636 = vmatprep.subr.mxu1 %v499_v4 }
  0xdf   :  { %637 = vmatpush2.msra.mxu1 %v498_v6  ;;  %v215_v6 = vld [vmem:[%s2214_s3] sm:$0xf] }
  0xe0   :  { %638 = vmatprep.subr.mxu1 %v496_v8  ;;  %v272_v8 = vrot.slane %v215_v6, %v1350_v13 }
  0xe1   :  { %639 = vmatpush2.msra.mxu1 %v495_v11  ;;  %v268_v11 = vrot.slane %v215_v6, %v1348_v12 }
  0xe2   :  { %640 = vmatprep.subr.mxu1 %v493_v16 }
  0xe3   :  { %641 = vmatpush2.msra.mxu1 %v492_v18 }
  0xe4   :  { %642 = vmatprep.subr.mxu1 %v490_v21 }
  0xe5   :  { %643 = vmatpush2.msra.mxu1 %v489_v26 }
  0xe6   :  { %644 = vmatprep.subr.mxu1 %v487_v28 }
  0xe7   :  { %645 = vmatpush2.msra.mxu1 %v486_v31 }
  0xe8   :  { %646 = vmatprep.subr.mxu1 %v484_v33 }
  0xe9   :  { %647 = vmatpush2.msra.mxu1 %v483_v35 }
  0xea   :  { %648 = vmatprep.subr.mxu1 %v481_v37 }
  0xeb   :  { %649 = vmatpush2.msra.mxu1 %v480_v39  ;;  %v410_v39 = vld [vmem:[%s2213_s5 + $0x2e0] sm:$0xff] }
  0xec   :  { %650 = vmatprep.subr.mxu1 %v478_v41  ;;  %v362_v41 = vld [vmem:[%s2213_s5 + $0x160] sm:$0xff] }
  0xed   :  { %651 = vmatpush2.msra.mxu1 %v477_v43  ;;  %v407_v43 = vld [vmem:[%s2213_s5 + $0x2c8] sm:$0xff] }
  0xee   :  { %652 = vmatprep.subr.mxu1 %v475_v45  ;;  %v359_v45 = vld [vmem:[%s2213_s5 + $0x148] sm:$0xff] }
  0xef   :  { %653 = vmatpush2.msra.mxu1 %v474_v47  ;;  %v404_v47 = vld [vmem:[%s2213_s5 + $0x2b0] sm:$0xff] }
  0xf0   :  { %654 = vmatprep.subr.mxu1 %v472_v49  ;;  %v356_v49 = vld [vmem:[%s2213_s5 + $0x130] sm:$0xff] }
  0xf1   :  { %655 = vmatpush2.msra.mxu1 %v471_v51  ;;  %v401_v51 = vld [vmem:[%s2213_s5 + $0x298] sm:$0xff] }
  0xf2   :  { %656 = vmatprep.subr.mxu1 %v469_v53  ;;  %v353_v53 = vld [vmem:[%s2213_s5 + $0x118] sm:$0xff] }
 0x15a   :  { %v221_v56 = vpop.xlane.xlu0 %220 }
 0x15b   :  { %v222_v57 = vmul.f32 0.0025, %v221_v56  ;;  %v468_v56 = vld [vmem:[%s2213_s5 + $0x4b0] sm:$0xff] }
 0x15c   :  { %657 = vmatpush2.msra.mxu1 %v468_v56  ;;  %v398_v56 = vld [vmem:[%s2213_s5 + $0x280] sm:$0xff] }
 0x15d   :  { %v1609_v59 = vsub.f32 %v1362_v23, %v222_v57  ;;  %v1612_v60 = vsub.f32 %v1364_v24, %v222_v57  ;;  %v1615_v61 = vsub.f32 %v1366_v25, %v222_v57  ;;  %v226_v62 = vsub.f32 %v1371_v29, %v222_v57  ;;  %v403_v29 = vld [vmem:[%s2213_s5 + $0x2a8] sm:$0xff]  ;;  %v370_v57 = vld [vmem:[%s2213_s5 + $0x1a0] sm:$0xff] }
 0x15e   :  { %565 = vmatprep.subr.mxu0 %v403_v29 }
 0x15f   :  { %v1618_v10 = vmul.f32 %v1088_v58, %v226_v62  ;;  %v248_v63 = vmul.f32 %v1609_v59, %v1609_v59  ;;  %v249_v0 = vmul.f32 %v1612_v60, %v1612_v60  ;;  %v250_v23 = vmul.f32 %v1615_v61, %v1615_v61  ;;  %566 = vmatpush2.msra.mxu0 %v402_v5  ;;  %v466_v58 = vld [vmem:[%s2213_s5 + $0x4a0] sm:$0xff]  ;;  %v369_v62 = vld [vmem:[%s2213_s5 + $0x198] sm:$0xff] }
 0x160   :  { %567 = vmatprep.subr.mxu0 %v400_v7  ;;  %658 = vmatprep.subr.mxu1 %v466_v58  ;;  %v216_v7 = vld [vmem:[%s2215_s4] sm:$0xf] }
 0x161   :  { %v252_v1 = vadd.f32 %v249_v0, %v248_v63  ;;  %v251_v24 = vmul.f32 %v1618_v10, %v1618_v10  ;;  %568 = vmatpush2.msra.mxu0 %v399_v9  ;;  %v465_v63 = vld [vmem:[%s2213_s5 + $0x498] sm:$0xff]  ;;  %v367_v0 = vld [vmem:[%s2213_s5 + $0x188] sm:$0xff]  ;;  %v280_v9 = vrot.slane %v215_v6, %v1360_v19  ;;  %v305_v18 = vrot.slane %v216_v7, %v1360_v19  ;;  %v350_v58 = vld [vmem:[%s2213_s5 + $0x100] sm:$0xff] }
 0x162   :  { %569 = vmatprep.subr.mxu0 %v397_v15  ;;  %659 = vmatpush2.msra.mxu1 %v465_v63  ;;  %v276_v15 = vrot.slane %v215_v6, %v1352_v14  ;;  %v301_v21 = vrot.slane %v216_v7, %v1352_v14  ;;  %v395_v63 = vld [vmem:[%s2213_s5 + $0x268] sm:$0xff]  ;;  %v341_v6 = vld [vmem:[%s2213_s5 + $0xb8] sm:$0xff] }
 0x163   :  { %v253_v2 = vadd.f32 %v252_v1, %v250_v23  ;;  %570 = vmatpush2.msra.mxu0 %v396_v17  ;;  %v463_v23 = vld [vmem:[%s2213_s5 + $0x488] sm:$0xff]  ;;  %v366_v1 = vld [vmem:[%s2213_s5 + $0x180] sm:$0xff]  ;;  %v297_v17 = vrot.slane %v216_v7, %v1350_v13 }
 0x164   :  { %571 = vmatprep.subr.mxu0 %v394_v20  ;;  %660 = vmatprep.subr.mxu1 %v463_v23  ;;  %v293_v20 = vrot.slane %v216_v7, %v1348_v12  ;;  %v347_v23 = vld [vmem:[%s2213_s5 + $0xe8] sm:$0xff]  ;;  %v437_v7 = vld [vmem:[%s2213_s5 + $0x3b8] sm:$0xff] }
 0x165   :  { %v254_v25 = vadd.f32 %v253_v2, %v251_v24  ;;  %572 = vmatpush2.msra.mxu0 %v393_v22  ;;  %v462_v24 = vld [vmem:[%s2213_s5 + $0x480] sm:$0xff]  ;;  %v413_v2 = vld [vmem:[%s2213_s5 + $0x2f8] sm:$0xff] }
 0x166   :  { %573 = vmatprep.subr.mxu0 %v391_v27  ;;  %661 = vmatpush2.msra.mxu1 %v462_v24  ;;  %v392_v24 = vld [vmem:[%s2213_s5 + $0x250] sm:$0xff] }
 0x167   :  { %255 = vadd.xlane.f32.xlu0 %v254_v25  ;;  %574 = vmatpush2.msra.mxu0 %v390_v30  ;;  %v509_v25 = vld [vmem:[%s2213_s5 + $0x5f8] sm:$0xff] }
 0x168   :  { %575 = vmatprep.subr.mxu0 %v388_v32  ;;  %1126 = vmatprep.subr.mxu1 %v509_v25  ;;  %v344_v25 = vld [vmem:[%s2213_s5 + $0xd0] sm:$0xff] }
 0x169   :  { %576 = vmatpush2.msra.mxu0 %v387_v34 }
 0x16a   :  { %577 = vmatprep.subr.mxu0 %v385_v36 }
 0x16b   :  { %578 = vmatpush2.msra.mxu0 %v384_v38 }
 0x16c   :  { %579 = vmatprep.subr.mxu0 %v382_v40  ;;  %v506_v40 = vld [vmem:[%s2213_s5 + $0x5e0] sm:$0xff] }
 0x16d   :  { %580 = vmatpush2.msra.mxu0 %v381_v42  ;;  %v458_v42 = vld [vmem:[%s2213_s5 + $0x460] sm:$0xff] }
 0x16e   :  { %581 = vmatprep.subr.mxu0 %v379_v44  ;;  %v503_v44 = vld [vmem:[%s2213_s5 + $0x5c8] sm:$0xff] }
 0x16f   :  { %582 = vmatpush2.msra.mxu0 %v378_v46  ;;  %v455_v46 = vld [vmem:[%s2213_s5 + $0x448] sm:$0xff] }
 0x170   :  { %583 = vmatprep.subr.mxu0 %v376_v48  ;;  %v500_v48 = vld [vmem:[%s2213_s5 + $0x5b0] sm:$0xff] }
 0x171   :  { %584 = vmatpush2.msra.mxu0 %v375_v50  ;;  %v452_v50 = vld [vmem:[%s2213_s5 + $0x430] sm:$0xff] }
 0x172   :  { %585 = vmatprep.subr.mxu0 %v373_v52  ;;  %v497_v52 = vld [vmem:[%s2213_s5 + $0x598] sm:$0xff] }
 0x173   :  { %586 = vmatpush2.msra.mxu0 %v372_v55  ;;  %v449_v55 = vld [vmem:[%s2213_s5 + $0x418] sm:$0xff] }
 0x174   :  { %587 = vmatprep.subr.mxu0 %v370_v57  ;;  %v494_v57 = vld [vmem:[%s2213_s5 + $0x580] sm:$0xff] }
 0x175   :  { %588 = vmatpush2.msra.mxu0 %v369_v62  ;;  %v446_v62 = vld [vmem:[%s2213_s5 + $0x400] sm:$0xff] }
 0x176   :  { %589 = vmatprep.subr.mxu0 %v367_v0  ;;  %v491_v0 = vld [vmem:[%s2213_s5 + $0x568] sm:$0xff] }
 0x177   :  { %590 = vmatpush2.msra.mxu0 %v366_v1  ;;  %v443_v1 = vld [vmem:[%s2213_s5 + $0x3e8] sm:$0xff] }
 0x178   :  { %1091 = vmatprep.subr.mxu0 %v413_v2  ;;  %v488_v2 = vld [vmem:[%s2213_s5 + $0x550] sm:$0xff] }
 0x1f0   :  { %v256_v29 = vpop.xlane.xlu0 %255 }
 0x1f1   :  { %v257_v4 = vmul.f32 0.0025, %v256_v29  ;;  %v440_v29 = vld [vmem:[%s2213_s5 + $0x3d0] sm:$0xff] }
 0x1f3   :  { %v258_v5 = vadd.f32 1e-05, %v257_v4  ;;  %v389_v4 = vld [vmem:[%s2213_s5 + $0x238] sm:$0xff] }
 0x1f5   :  { %1250 = vrsqrt.f32 %v258_v5  ;;  %v485_v5 = vld [vmem:[%s2213_s5 + $0x538] sm:$0xff] }
 0x202   :  { %v1251_v16 = vpop.eup %1250 }
 0x203   :  { %v261_v22 = vmul.f32 %v1251_v16, %v1612_v60  ;;  %v263_v26 = vmul.f32 %v1251_v16, %v1618_v10  ;;  %v260_v27 = vmul.f32 %v1251_v16, %v1609_v59  ;;  %v262_v28 = vmul.f32 %v1251_v16, %v1615_v61  ;;  %v365_v59 = vld [vmem:[%s2213_s5 + $0x178] sm:$0xff]  ;;  %v383_v16 = vld [vmem:[%s2213_s5 + $0x208] sm:$0xff] }
 0x204   :  { %v461_v61 = vld [vmem:[%s2213_s5 + $0x478] sm:$0xff] }
 0x205   :  { %v286_v30 = vmul.f32 %v272_v8, %v261_v22  ;;  %v288_v31 = vmul.f32 %v280_v9, %v263_v26  ;;  %v285_v32 = vmul.f32 %v268_v11, %v260_v27  ;;  %v287_v33 = vmul.f32 %v276_v15, %v262_v28  ;;  %v386_v8 = vld [vmem:[%s2213_s5 + $0x220] sm:$0xff]  ;;  %v476_v22 = vld [vmem:[%s2213_s5 + $0x4f0] sm:$0xff]  ;;  %v377_v28 = vld [vmem:[%s2213_s5 + $0x1d8] sm:$0xff] }
 0x206   :  { %v482_v9 = vld [vmem:[%s2213_s5 + $0x520] sm:$0xff]  ;;  %v332_v26 = vld [vmem:[%s2213_s5 + $0x70] sm:$0xff] }
 0x207   :  { %v311_v34 = vadd.f32 %v297_v17, %v286_v30  ;;  %v313_v35 = vadd.f32 %v305_v18, %v288_v31  ;;  %v1808_v36 = vadd.f32 %v293_v20, %v285_v32  ;;  %v1810_v19 = vadd.f32 %v301_v21, %v287_v33  ;;  %v338_v11 = vld [vmem:[%s2213_s5 + $0xa0] sm:$0xff]  ;;  %v479_v17 = vld [vmem:[%s2213_s5 + $0x508] sm:$0xff]  ;;  %v380_v21 = vld [vmem:[%s2213_s5 + $0x1f0] sm:$0xff] }
 0x208   :  { %v434_v15 = vld [vmem:[%s2213_s5 + $0x3a0] sm:$0xff]  ;;  %v335_v18 = vld [vmem:[%s2213_s5 + $0x88] sm:$0xff]  ;;  %v428_v27 = vld [vmem:[%s2213_s5 + $0x370] sm:$0xff] }
 0x209   :  { %v315_v37 = vmax.f32 %v311_v34, 0.0  ;;  %v317_v38 = vmax.f32 %v313_v35, 0.0  ;;  %v314_v60 = vmax.f32 %v1808_v36, 0.0  ;;  %v316_v10 = vmax.f32 %v1810_v19, 0.0  ;;  %v431_v20 = vld [vmem:[%s2213_s5 + $0x388] sm:$0xff]  ;;  %v473_v30 = vld [vmem:[%s2213_s5 + $0x4d8] sm:$0xff] }
 0x20a   :  { %v329_v31 = vld [vmem:[%s2213_s5 + $0x58] sm:$0xff]  ;;  %v374_v33 = vld [vmem:[%s2213_s5 + $0x1c0] sm:$0xff] }
 0x20b   :  { %591 = vmatprep.mubr.f32.mxu0 %v315_v37  ;;  %662 = vmatprep.mubr.f32.mxu1 %v317_v38  ;;  %v425_v32 = vld [vmem:[%s2213_s5 + $0x358] sm:$0xff]  ;;  %v470_v34 = vld [vmem:[%s2213_s5 + $0x4c0] sm:$0xff] }
 0x20c   :  { %592 = vmatmul.mubr.f32.vlgmr.msra.gmra.mxu0 %v314_v60  ;;  %663 = vmatmul.mubr.f32.vlgmr.msra.gmra.mxu1 %v316_v10  ;;  %v326_v35 = vld [vmem:[%s2213_s5 + $0x40] sm:$0xff] }
 0x20d   :  { %1092 = vmatpush3.msra.mxu0 %v365_v59  ;;  %1127 = vmatpush3.msra.mxu1 %v461_v61  ;;  %v467_v59 = vld [vmem:[%s2213_s5 + $0x4a8] sm:$0xff] }
 0x20e   :  { %1093 = vmatprep.subr.mxu0 %v410_v39  ;;  %733 = vmatprep.mubr.f32.mxu0 %v315_v37  ;;  %v422_v37 = vld [vmem:[%s2213_s5 + $0x340] sm:$0xff]  ;;  %v323_v61 = vld [vmem:[%s2213_s5 + $0x28] sm:$0xff] }
 0x20f   :  { %1128 = vmatprep.subr.mxu1 %v506_v40  ;;  %803 = vmatprep.mubr.f32.mxu1 %v317_v38  ;;  %v371_v38 = vld [vmem:[%s2213_s5 + $0x1a8] sm:$0xff]  ;;  %v368_v40 = vld [vmem:[%s2213_s5 + $0x190] sm:$0xff] }
 0x210   :  { %1094 = vmatpush3.msra.mxu0 %v362_v41  ;;  %1129 = vmatpush3.msra.mxu1 %v458_v42  ;;  %v419_v39 = vld [vmem:[%s2213_s5 + $0x328] sm:$0xff]  ;;  %v464_v41 = vld [vmem:[%s2213_s5 + $0x490] sm:$0xff] }
 0x211   :  { %1095 = vmatprep.subr.mxu0 %v407_v43  ;;  %1130 = vmatprep.subr.mxu1 %v503_v44  ;;  %v320_v42 = vld [vmem:[%s2213_s5 + $0x10] sm:$0xff] }
 0x212   :  { %1096 = vmatpush3.msra.mxu0 %v359_v45  ;;  %1131 = vmatpush3.msra.mxu1 %v455_v46  ;;  %v416_v43 = vld [vmem:[%s2213_s5 + $0x310] sm:$0xff]  ;;  %v510_v45 = vld [vmem:[%s2216_s6] sm:$0x7] }
 0x213   :  { %1097 = vmatprep.subr.mxu0 %v404_v47  ;;  %1132 = vmatprep.subr.mxu1 %v500_v48  ;;  %v519_v47 = vrot.slane %v510_v45, %v1350_v13  ;;  %v523_v19 = vrot.slane %v510_v45, %v1352_v14 }
 0x214   :  { %1098 = vmatpush3.msra.mxu0 %v356_v49  ;;  %1133 = vmatpush3.msra.mxu1 %v452_v50  ;;  %v515_v49 = vrot.slane %v510_v45, %v1348_v12  ;;  %v892_v45 = vld [vmem:[%s2217_s9 + $0x38] sm:$0xff] }
 0x215   :  { %1099 = vmatprep.subr.mxu0 %v401_v51  ;;  %1134 = vmatprep.subr.mxu1 %v497_v52 }
 0x216   :  { %1100 = vmatpush3.msra.mxu0 %v353_v53  ;;  %1135 = vmatpush3.msra.mxu1 %v449_v55 }
 0x217   :  { %1101 = vmatprep.subr.mxu0 %v398_v56  ;;  %1136 = vmatprep.subr.mxu1 %v494_v57 }
 0x218   :  { %1102 = vmatpush3.msra.mxu0 %v350_v58  ;;  %1137 = vmatpush3.msra.mxu1 %v446_v62 }
 0x219   :  { %1103 = vmatprep.subr.mxu0 %v395_v63  ;;  %1138 = vmatprep.subr.mxu1 %v491_v0 }
 0x21a   :  { %1104 = vmatpush3.msra.mxu0 %v347_v23  ;;  %1139 = vmatpush3.msra.mxu1 %v443_v1  ;;  %v916_v1 = vld [vmem:[%s2217_s9 + $0xf8] sm:$0xff] }
 0x21b   :  { %1105 = vmatprep.subr.mxu0 %v392_v24  ;;  %1140 = vmatprep.subr.mxu1 %v488_v2  ;;  %v932_v24 = vld [vmem:[%s2217_s9 + $0x178] sm:$0xff] }
 0x21c   :  { %1106 = vmatpush3.msra.mxu0 %v344_v25  ;;  %1141 = vmatpush3.msra.mxu1 %v440_v29  ;;  %v900_v2 = vld [vmem:[%s2217_s9 + $0x78] sm:$0xff]  ;;  %v915_v25 = vld [vmem:[%s2217_s9 + $0xf0] sm:$0xff] }
 0x21d   :  { %1107 = vmatprep.subr.mxu0 %v389_v4  ;;  %1142 = vmatprep.subr.mxu1 %v485_v5  ;;  %v931_v29 = vld [vmem:[%s2217_s9 + $0x170] sm:$0xff]  ;;  %v914_v5 = vld [vmem:[%s2217_s9 + $0xe8] sm:$0xff] }
 0x21e   :  { %1108 = vmatpush3.msra.mxu0 %v341_v6  ;;  %1143 = vmatpush3.msra.mxu1 %v437_v7  ;;  %v899_v4 = vld [vmem:[%s2217_s9 + $0x70] sm:$0xff]  ;;  %v930_v6 = vld [vmem:[%s2217_s9 + $0x168] sm:$0xff]  ;;  %v230_v7 = vadd.s32 256, %v1604_v54 }
 0x21f   :  { %1109 = vmatprep.subr.mxu0 %v386_v8  ;;  %1144 = vmatprep.subr.mxu1 %v482_v9 }
 0x220   :  { %1110 = vmatpush3.msra.mxu0 %v338_v11  ;;  %1145 = vmatpush3.msra.mxu1 %v434_v15  ;;  %vm821_vm2 = vcmp.lt.s32.totalorder %v230_v7, 300 }
 0x221   :  { %1111 = vmatprep.subr.mxu0 %v383_v16  ;;  %1146 = vmatprep.subr.mxu1 %v479_v17  ;;  %v1089_v11 = vsel %vm821_vm2, 1.0, %v1256_v3 }
 0x222   :  { %1112 = vmatpush3.msra.mxu0 %v335_v18  ;;  %1147 = vmatpush3.msra.mxu1 %v431_v20 }
 0x223   :  { %1113 = vmatprep.subr.mxu0 %v380_v21  ;;  %1148 = vmatprep.subr.mxu1 %v476_v22 }
 0x224   :  { %1114 = vmatpush3.msra.mxu0 %v332_v26  ;;  %1149 = vmatpush3.msra.mxu1 %v428_v27  ;;  %v898_v27 = vld [vmem:[%s2217_s9 + $0x68] sm:$0xff] }
 0x225   :  { %1115 = vmatprep.subr.mxu0 %v377_v28  ;;  %1150 = vmatprep.subr.mxu1 %v473_v30  ;;  %v913_v28 = vld [vmem:[%s2217_s9 + $0xe0] sm:$0xff] }
 0x226   :  { %1116 = vmatpush3.msra.mxu0 %v329_v31  ;;  %1151 = vmatpush3.msra.mxu1 %v425_v32  ;;  %v929_v30 = vld [vmem:[%s2217_s9 + $0x160] sm:$0xff]  ;;  %v912_v32 = vld [vmem:[%s2217_s9 + $0xd8] sm:$0xff] }
 0x227   :  { %1117 = vmatprep.subr.mxu0 %v374_v33  ;;  %1152 = vmatprep.subr.mxu1 %v470_v34  ;;  %v897_v31 = vld [vmem:[%s2217_s9 + $0x60] sm:$0xff]  ;;  %v928_v33 = vld [vmem:[%s2217_s9 + $0x158] sm:$0xff] }
 0x228   :  { %1118 = vmatpush3.msra.mxu0 %v326_v35  ;;  %1153 = vmatpush3.msra.mxu1 %v422_v37  ;;  %v896_v34 = vld [vmem:[%s2217_s9 + $0x58] sm:$0xff]  ;;  %v911_v35 = vld [vmem:[%s2217_s9 + $0xd0] sm:$0xff] }
 0x229   :  { %1119 = vmatprep.subr.mxu0 %v371_v38  ;;  %1154 = vmatprep.subr.mxu1 %v467_v59  ;;  %v927_v37 = vld [vmem:[%s2217_s9 + $0x150] sm:$0xff]  ;;  %v910_v59 = vld [vmem:[%s2217_s9 + $0xc8] sm:$0xff] }
 0x22a   :  { %1120 = vmatpush3.msra.mxu0 %v323_v61  ;;  %1155 = vmatpush3.msra.mxu1 %v419_v39  ;;  %v895_v38 = vld [vmem:[%s2217_s9 + $0x50] sm:$0xff]  ;;  %v926_v61 = vld [vmem:[%s2217_s9 + $0x148] sm:$0xff] }
 0x22b   :  { %1121 = vmatprep.subr.mxu0 %v368_v40  ;;  %1156 = vmatprep.subr.mxu1 %v464_v41  ;;  %v894_v39 = vld [vmem:[%s2217_s9 + $0x48] sm:$0xff]  ;;  %v909_v40 = vld [vmem:[%s2217_s9 + $0xc0] sm:$0xff] }
 0x22c   :  { %1122 = vmatpush3.msra.mxu0 %v320_v42  ;;  %1157 = vmatpush3.msra.mxu1 %v416_v43  ;;  %v925_v41 = vld [vmem:[%s2217_s9 + $0x140] sm:$0xff]  ;;  %v908_v43 = vld [vmem:[%s2217_s9 + $0xb8] sm:$0xff] }
 0x22d   :  { %734 = vmatmul.mubr.f32.vlgmr.msra.gmra.mxu0 %v314_v60  ;;  %804 = vmatmul.mubr.f32.vlgmr.msra.gmra.mxu1 %v316_v10  ;;  %v893_v42 = vld [vmem:[%s2217_s9 + $0x40] sm:$0xff] }
 0x22e   :  { %1213 = vmatprep.subr.mxu1 %v1256_v3  ;;  %1161 = vmatprep.subr.mxu0 %v916_v1  ;;  %v885_v1 = vld [vmem:[%s2217_s9] sm:$0xff] }
 0x22f   :  { %1214 = vmatpush3.msra.mxu1 %v932_v24  ;;  %1162 = vmatpush3.msra.mxu0 %v900_v2 }
 0x230   :  { %1215 = vmatprep.subr.mxu1 %v1256_v3  ;;  %1163 = vmatprep.subr.mxu0 %v915_v25 }
 0x231   :  { %1216 = vmatpush3.msra.mxu1 %v931_v29  ;;  %1164 = vmatpush3.msra.mxu0 %v899_v4  ;;  %v809_v29 = vld [vmem:[%s2218_s7] sm:$0x7] }
 0x232   :  { %1217 = vmatprep.subr.mxu1 %v1256_v3  ;;  %1165 = vmatprep.subr.mxu0 %v914_v5  ;;  %v810_v4 = vld [vmem:[%s2219_s8] sm:$0x7]  ;;  %v852_v5 = vrot.slane %v809_v29, %v1350_v13  ;;  %v848_v7 = vrot.slane %v809_v29, %v1348_v12 }
 0x233   :  { %1218 = vmatpush3.msra.mxu1 %v930_v6  ;;  %1166 = vmatpush3.msra.mxu0 %v898_v27  ;;  %v856_v6 = vrot.slane %v809_v29, %v1352_v14 }
 0x234   :  { %1219 = vmatprep.subr.mxu1 %v1256_v3  ;;  %1167 = vmatprep.subr.mxu0 %v913_v28 }
 0x235   :  { %1220 = vmatpush3.msra.mxu1 %v929_v30  ;;  %1168 = vmatpush3.msra.mxu0 %v897_v31 }
 0x236   :  { %1221 = vmatprep.subr.mxu1 %v1256_v3  ;;  %1169 = vmatprep.subr.mxu0 %v912_v32 }
 0x237   :  { %1222 = vmatpush3.msra.mxu1 %v928_v33  ;;  %1170 = vmatpush3.msra.mxu0 %v896_v34 }
 0x238   :  { %1223 = vmatprep.subr.mxu1 %v1256_v3  ;;  %1171 = vmatprep.subr.mxu0 %v911_v35 }
 0x239   :  { %1224 = vmatpush3.msra.mxu1 %v927_v37  ;;  %1172 = vmatpush3.msra.mxu0 %v895_v38 }
 0x23a   :  { %1225 = vmatprep.subr.mxu1 %v1256_v3  ;;  %1173 = vmatprep.subr.mxu0 %v910_v59 }
 0x23b   :  { %1226 = vmatpush3.msra.mxu1 %v926_v61  ;;  %1174 = vmatpush3.msra.mxu0 %v894_v39 }
 0x23c   :  { %1227 = vmatprep.subr.mxu1 %v1256_v3  ;;  %1175 = vmatprep.subr.mxu0 %v909_v40 }
 0x23d   :  { %1228 = vmatpush3.msra.mxu1 %v925_v41  ;;  %1176 = vmatpush3.msra.mxu0 %v893_v42 }
 0x23e   :  { %1229 = vmatprep.subr.mxu1 %v1256_v3  ;;  %1177 = vmatprep.subr.mxu0 %v908_v43 }
 0x23f   :  { %1178 = vmatpush3.msra.mxu0 %v892_v45  ;;  %1245 = vmatprep.mubr.msk.f32.mxu1 %vm1257_vm3, %v1256_v3 }
 0x2cc   :  { %v593_v44 = vpop.f32.mrf.mxu0  ;;  %v664_v46 = vpop.f32.mrf.mxu1 }
 0x2cd   :  { %v594_v52 = vadd.f32 %v593_v44, %v515_v49  ;;  %v924_v44 = vld [vmem:[%s2217_s9 + $0x138] sm:$0xff]  ;;  %v906_v49 = vld [vmem:[%s2217_s9 + $0xa8] sm:$0xff] }
 0x2ce   :  { %v595_v48 = vpop.f32.mrf.mxu0  ;;  %v666_v50 = vpop.f32.mrf.mxu1  ;;  %1230 = vmatpush3.msra.mxu1 %v924_v44 }
 0x2cf   :  { %v596_v51 = vadd.f32 %v595_v48, %v519_v47  ;;  %v665_v57 = vadd.f32 %v664_v46, %v594_v52  ;;  %v907_v46 = vld [vmem:[%s2217_s9 + $0xb0] sm:$0xff]  ;;  %1231 = vmatprep.subr.mxu1 %v1256_v3  ;;  %v889_v52 = vld [vmem:[%s2217_s9 + $0x20] sm:$0xff] }
 0x2d0   :  { %v923_v47 = vld [vmem:[%s2217_s9 + $0x130] sm:$0xff]  ;;  %1179 = vmatprep.subr.mxu0 %v907_v46 }
 0x2d1   :  { %v667_v55 = vadd.f32 %v666_v50, %v596_v51  ;;  %v891_v48 = vld [vmem:[%s2217_s9 + $0x30] sm:$0xff]  ;;  %v922_v50 = vld [vmem:[%s2217_s9 + $0x128] sm:$0xff]  ;;  %1232 = vmatpush3.msra.mxu1 %v923_v47 }
 0x2d2   :  { %v890_v51 = vld [vmem:[%s2217_s9 + $0x28] sm:$0xff]  ;;  %1180 = vmatpush3.msra.mxu0 %v891_v48  ;;  %1233 = vmatprep.subr.mxu1 %v1256_v3 }
 0x2d3   :  { %v811_v0 = vadd.f32 %v667_v55, %v665_v57  ;;  %1181 = vmatprep.subr.mxu0 %v906_v49  ;;  %1234 = vmatpush3.msra.mxu1 %v922_v50 }
 0x2d4   :  { %1182 = vmatpush3.msra.mxu0 %v890_v51  ;;  %1235 = vmatprep.subr.mxu1 %v1256_v3 }
 0x2ed   :  { %v1123_v36 = vpop.f32.mrf.mxu0  ;;  %v1158_v60 = vpop.f32.mrf.mxu1 }
 0x2ef   :  { %v1124_v10 = vpop.f32.mrf.mxu0  ;;  %v1159_v53 = vpop.f32.mrf.mxu1 }
 0x2f0   :  { %v1125_v56 = vadd.f32 %v1124_v10, %v1123_v36  ;;  %v1160_v62 = vadd.f32 %v1159_v53, %v1158_v60  ;;  %v905_v36 = vld [vmem:[%s2217_s9 + $0xa0] sm:$0xff]  ;;  %v920_v10 = vld [vmem:[%s2217_s9 + $0x118] sm:$0xff] }
 0x2f1   :  { %v921_v60 = vld [vmem:[%s2217_s9 + $0x120] sm:$0xff]  ;;  %1183 = vmatprep.subr.mxu0 %v905_v36  ;;  %v888_v53 = vld [vmem:[%s2217_s9 + $0x18] sm:$0xff] }
 0x2f2   :  { %v736_v58 = vadd.f32 %v1125_v56, %v523_v19  ;;  %v904_v19 = vld [vmem:[%s2217_s9 + $0x98] sm:$0xff]  ;;  %1236 = vmatpush3.msra.mxu1 %v921_v60  ;;  %1184 = vmatpush3.msra.mxu0 %v889_v52  ;;  %v919_v56 = vld [vmem:[%s2217_s9 + $0x110] sm:$0xff] }
 0x2f3   :  { %1237 = vmatprep.subr.mxu1 %v1256_v3  ;;  %1185 = vmatprep.subr.mxu0 %v904_v19 }
 0x2f4   :  { %v806_v63 = vadd.f32 %v1160_v62, %v736_v58  ;;  %1238 = vmatpush3.msra.mxu1 %v920_v10  ;;  %1186 = vmatpush3.msra.mxu0 %v888_v53  ;;  %v902_v58 = vld [vmem:[%s2217_s9 + $0x88] sm:$0xff] }
 0x2f5   :  { %1239 = vmatprep.subr.mxu1 %v1256_v3  ;;  %v918_v62 = vld [vmem:[%s2217_s9 + $0x108] sm:$0xff] }
 0x2f6   :  { %v812_v23 = vadd.f32 %v811_v0, %v806_v63  ;;  %1240 = vmatpush3.msra.mxu1 %v919_v56  ;;  %v901_v0 = vld [vmem:[%s2217_s9 + $0x80] sm:$0xff] }
 0x2f7   :  { %1241 = vmatprep.subr.mxu1 %v1256_v3 }
 0x2f8   :  { %813 = vadd.xlane.f32.xlu1 %v812_v23  ;;  %v917_v23 = vld [vmem:[%s2217_s9 + $0x100] sm:$0xff]  ;;  %1242 = vmatpush3.msra.mxu1 %v918_v62 }
 0x2f9   :  { %1243 = vmatprep.subr.mxu1 %v1256_v3 }
 0x2fa   :  { %1244 = vmatpush3.msra.mxu1 %v917_v23 }
 0x381   :  { %v814_v8 = vpop.xlane.xlu1 %813 }
 0x382   :  { %v815_v9 = vmul.f32 0.0033333334, %v814_v8  ;;  %v871_v8 = vrot.slane %v810_v4, %v1350_v13 }
 0x384   :  { %v2044_v15 = vsub.f32 %v665_v57, %v815_v9  ;;  %v2046_v16 = vsub.f32 %v667_v55, %v815_v9  ;;  %v818_v17 = vsub.f32 %v806_v63, %v815_v9  ;;  %v903_v55 = vld [vmem:[%s2217_s9 + $0x90] sm:$0xff]  ;;  %v886_v63 = vld [vmem:[%s2217_s9 + $0x8] sm:$0xff]  ;;  %v875_v9 = vrot.slane %v810_v4, %v1352_v14 }
 0x385   :  { %v887_v57 = vld [vmem:[%s2217_s9 + $0x10] sm:$0xff]  ;;  %1187 = vmatprep.subr.mxu0 %v903_v55 }
 0x386   :  { %v2048_v18 = vmul.f32 %v1089_v11, %v818_v17  ;;  %v831_v20 = vmul.f32 %v2044_v15, %v2044_v15  ;;  %v832_v21 = vmul.f32 %v2046_v16, %v2046_v16  ;;  %1188 = vmatpush3.msra.mxu0 %v887_v57 }
 0x387   :  { %1189 = vmatprep.subr.mxu0 %v902_v58 }
 0x388   :  { %v833_v54 = vmul.f32 %v2048_v18, %v2048_v18  ;;  %v834_v22 = vadd.f32 %v832_v21, %v831_v20  ;;  %1190 = vmatpush3.msra.mxu0 %v886_v63  ;;  %v867_v21 = vrot.slane %v810_v4, %v1348_v12 }
 0x389   :  { %1191 = vmatprep.subr.mxu0 %v901_v0 }
 0x38a   :  { %v835_v26 = vadd.f32 %v834_v22, %v833_v54  ;;  %1192 = vmatpush3.msra.mxu0 %v885_v1 }
 0x38c   :  { %836 = vadd.xlane.f32.xlu1 %v835_v26 }
 0x415   :  { %v837_v24 = vpop.xlane.xlu1 %836 }
 0x416   :  { %v838_v2 = vmul.f32 0.0033333334, %v837_v24 }
 0x418   :  { %v839_v25 = vadd.f32 1e-05, %v838_v2 }
 0x41a   :  { %1252 = vrsqrt.f32 %v839_v25 }
 0x427   :  { %v1253_v3 = vpop.eup %1252 }
 0x428   :  { %v842_v11 = vmul.f32 %v1253_v3, %v2046_v16  ;;  %v843_v17 = vmul.f32 %v1253_v3, %v2048_v18  ;;  %v841_v20 = vmul.f32 %v1253_v3, %v2044_v15  ;;  %v1090_v15 = vld [vmem:[%s2220_s10] ss:$0 sm:$0xff] }
 0x42a   :  { %v861_v54 = vmul.f32 %v852_v5, %v842_v11  ;;  %v862_v22 = vmul.f32 %v856_v6, %v843_v17  ;;  %v860_v26 = vmul.f32 %v848_v7, %v841_v20 }
 0x42c   :  { %v880_v27 = vadd.f32 %v871_v8, %v861_v54  ;;  %v881_v28 = vadd.f32 %v875_v9, %v862_v22  ;;  %v879_v30 = vadd.f32 %v867_v21, %v860_v26 }
 0x42e   :  { %v883_v31 = vmax.f32 %v880_v27, 0.0  ;;  %v884_v32 = vmax.f32 %v881_v28, 0.0  ;;  %v882_v33 = vmax.f32 %v879_v30, 0.0 }
 0x430   :  { %1004 = vmatprep.mubr.f32.mxu0 %v883_v31  ;;  %1246 = vmatmul.mubr.f32.vlgmr.msra.gmra.mxu1 %v884_v32 }
 0x431   :  { %1005 = vmatmul.mubr.f32.vlgmr.msra.gmra.mxu0 %v882_v33 }
 0x4f0   :  { %v1076_v13 = vpop.f32.mrf.mxu1 }
 0x4f1   :  { %v1193_v14 = vpop.f32.mrf.mxu0 }
 0x4f2   :  { %v1247_v16 = vpop.f32.mrf.mxu1 }
 0x4f3   :  { %v1194_v12 = vpop.f32.mrf.mxu0 }
 0x4f4   :  { %v1195_v18 = vadd.f32 %v1194_v12, %v1193_v14 }
 0x4f6   :  { %v1007_v34 = vadd.f32 %v1195_v18, %v1090_v15 }
 0x4f8   :  { %v1077_v35 = vadd.f32 %v1076_v13, %v1007_v34 }
 0x4fa   :  { %1254 = vtanh.f32 %v1077_v35 }
 0x507   :  { %v1255_v37 = vpop.eup %1254 }
 0x508   :  { %1081 = vst [vmem:[%s2221_s11] sm:$0xff] %v1255_v37 }

</bundles_post_ra>
